<compile_context>
chip_gen: v7x
topology: tpu7x:2x2x1
jax: 0.10.0
libtpu: 0.0.40
codegen_flags: <defaults>
</compile_context>

<pallas_src>
import jax
import jax.numpy as jnp
from jax.experimental import pallas as pl
from jax.experimental.pallas import tpu as pltpu


def _round_up(n, m):
    return ((n + m - 1) // m) * m


# ----------------------------------------------------------------------------
# Pallas kernel: one batch tile of  relu(x @ W1 + b1) @ W2 + b2
# ----------------------------------------------------------------------------
def _policy_kernel(x_ref, w1_ref, b1_ref, w2_ref, b2_ref, logits_ref):
    # shared_features: Linear(input_size, hidden) + ReLU
    # x arrives in its HBM dtype (f32); cast to bf16 in-kernel for the MXU.
    x = x_ref[...].astype(jnp.bfloat16)
    h = jnp.dot(x, w1_ref[...], preferred_element_type=jnp.float32)
    h = jnp.maximum(h + b1_ref[...], 0.0)                     # f32 bias+ReLU on VPU
    # actor: Linear(hidden, num_actions), padded to 128 lanes for a lane-dense store
    logits = jnp.dot(h.astype(jnp.bfloat16), w2_ref[...],
                     preferred_element_type=jnp.float32)
    logits_ref[...] = (logits + b2_ref[...]).astype(logits_ref.dtype)   # bf16 store


# ----------------------------------------------------------------------------
# One-time parameter preprocessing (hoisted out of the per-call path)
# ----------------------------------------------------------------------------
def prepare_policy_params(w1, b1, w2, b2):
    """w1: (in, hidden), b1: (1, hidden), w2: (hidden, A), b2: (1, A).
    Pre-casts weights to bf16 and zero-pads the actor weight/bias to 128 lanes
    exactly once, so the forward path does no per-call weight reshaping."""
    H = w1.shape[1]
    A = w2.shape[1]
    A_pad = _round_up(A, 128)
    w1_b = w1.astype(jnp.bfloat16)
    b1_f = b1.reshape(1, H).astype(jnp.float32)
    w2_p = jnp.zeros((H, A_pad), jnp.bfloat16).at[:, :A].set(w2.astype(jnp.bfloat16))
    b2_p = jnp.zeros((1, A_pad), jnp.float32).at[:, :A].set(
        b2.reshape(1, A).astype(jnp.float32))
    return {"w1": w1_b, "b1": b1_f, "w2": w2_p, "b2": b2_p, "num_actions": A}


# ----------------------------------------------------------------------------
# Forward wrapper
# ----------------------------------------------------------------------------
def base_policy_forward(x, params, *, tm=2048):
    """x: (B, input_size) float; params from prepare_policy_params().
    Returns logits (B, num_actions) float32."""
    B, D_in = x.shape
    w1, b1, w2, b2 = params["w1"], params["b1"], params["w2"], params["b2"]
    A = params["num_actions"]
    H = w1.shape[1]
    A_pad = w2.shape[1]

    # Batch tile: multiple of 16 (bf16 sublane packing of the output tile),
    # capped at ceil(B/2) so large batches always split into >= 2 grid tiles
    # (lets v7x's two TensorCores both get work), never larger than the batch.
    tm_eff = min(tm, _round_up(pl.cdiv(B, 2), 16))
    tm_eff = max(8, min(tm_eff, _round_up(B, 8)))
    n_tiles = pl.cdiv(B, tm_eff)   # ragged last tile handled by Pallas masking

    vmem = pltpu.MemorySpace.VMEM
    out = pl.pallas_call(
        _policy_kernel,
        # bf16, 128-lane padded output: halves writeback vs f32; wrapper slices
        # to A lanes and casts back to f32 (downstream loss math stays f32).
        out_shape=jax.ShapeDtypeStruct((B, A_pad), jnp.bfloat16),
        grid_spec=pltpu.PrefetchScalarGridSpec(
            num_scalar_prefetch=0,
            grid=(n_tiles,),
            in_specs=[
                # x: tiled along batch, double-buffered across grid steps.
                pl.BlockSpec((tm_eff, D_in), lambda i: (i, 0), memory_space=vmem),
                # weights/biases: constant index_map -> VMEM-resident across grid.
                pl.BlockSpec((D_in, H), lambda i: (0, 0), memory_space=vmem),
                pl.BlockSpec((1, H), lambda i: (0, 0), memory_space=vmem),
                pl.BlockSpec((H, A_pad), lambda i: (0, 0), memory_space=vmem),
                pl.BlockSpec((1, A_pad), lambda i: (0, 0), memory_space=vmem),
            ],
            out_specs=pl.BlockSpec((tm_eff, A_pad), lambda i: (i, 0),
                                   memory_space=vmem),
        ),
        # Batch axis is embarrassingly parallel -> sharded across v7x's 2 TCs
        # (harmless no-op on single-TC v5e/v6e).
        compiler_params=pltpu.CompilerParams(
            dimension_semantics=("parallel",)),
    )(x, w1, b1, w2, b2)

    # Only garbage rows from the ragged last tile are masked by Pallas (never
    # written); padded lanes [A:128] are dropped here. Do not reduce over the
    # padded lanes without this slice.
    return out[:, :A].astype(jnp.float32)


# ----------------------------------------------------------------------------
# Deterministic parameter init (mirrors nn.Linear + xavier_uniform on weights)
# ----------------------------------------------------------------------------
def xavier_uniform_init(key, fan_in, fan_out):
    a = (6.0 / (fan_in + fan_out)) ** 0.5
    # PyTorch Linear weight is (out, in); build that way then transpose to (in, out).
    w = jax.random.uniform(key, (fan_out, fan_in), jnp.float32, -a, a)
    return w.T


def bias_init(key, fan_in, fan_out):
    bound = 1.0 / (fan_in ** 0.5)
    return jax.random.uniform(key, (1, fan_out), jnp.float32, -bound, bound)


if __name__ == "__main__":
    # policy_config-equivalent (synthetic, small):
    base_input_size = 16
    is_self_play = True
    input_size = base_input_size * 2 if is_self_play else base_input_size   # 32
    shared_features_size = 64
    shared_features_size_output = shared_features_size                      # no memory concat
    num_actions = 8
    batch = 8

    key = jax.random.PRNGKey(0)
    kx, kw1, kb1, kw2, kb2 = jax.random.split(key, 5)

    x = jax.random.normal(kx, (batch, input_size), jnp.float32)
    w1 = xavier_uniform_init(kw1, input_size, shared_features_size)
    b1 = bias_init(kb1, input_size, shared_features_size)
    w2 = xavier_uniform_init(kw2, shared_features_size_output, num_actions)
    b2 = bias_init(kb2, shared_features_size_output, num_actions)

    # Pre-cast / pre-pad weights once (not per forward call).
    params = prepare_policy_params(w1, b1, w2, b2)

    logits = base_policy_forward(x, params)
    jax.block_until_ready(logits)

    # Pure-JAX f32 reference (kernel uses bf16 MXU inputs + bf16 output with
    # f32 accumulation, so allow bf16-level tolerance).
    h_ref = jnp.maximum(x @ w1 + b1, 0.0)
    logits_ref = h_ref @ w2 + b2
    assert logits.shape == (batch, num_actions)
    assert jnp.allclose(logits, logits_ref, atol=3e-2, rtol=3e-2)

    # Multi-tile grid path with a ragged last tile (B=40, tm=16 -> grid=(3,)).
    batch2 = 40
    x2 = jax.random.normal(jax.random.PRNGKey(1), (batch2, input_size), jnp.float32)
    logits2 = base_policy_forward(x2, params, tm=16)
    jax.block_until_ready(logits2)
    ref2 = jnp.maximum(x2 @ w1 + b1, 0.0) @ w2 + b2
    assert logits2.shape == (batch2, num_actions)
    assert jnp.allclose(logits2, ref2, atol=3e-2, rtol=3e-2)

    # TODO(synk): BasePolicy.forward is literally `pass` in the reference; the
    # memory modules (BaseMemory/LstmMemory), bookkeeping, save/load and RNG-state
    # IO paths have no Pallas-kernel equivalent and are intentionally omitted.
    # (Further large-batch win available by compacting 16 rows x 8 logits into one
    # 128-lane row before the store; skipped to keep the lowering simple/safe.)
    print("KERNEL_OK")
</pallas_src>

<mosaic_0001>
module attributes {stable_mosaic.version = 11 : i64} {
  func.func @_policy_kernel(%arg0: i32, %arg1: memref<8x32xf32, #tpu.memory_space<vmem>>, %arg2: memref<32x64xbf16, #tpu.memory_space<vmem>>, %arg3: memref<1x64xf32, #tpu.memory_space<vmem>>, %arg4: memref<64x128xbf16, #tpu.memory_space<vmem>>, %arg5: memref<1x128xf32, #tpu.memory_space<vmem>>, %arg6: memref<8x128xbf16, #tpu.memory_space<vmem>>) attributes {dimension_semantics = [#tpu.dimension_semantics<parallel>], iteration_bounds = array<i64: 1>, scalar_prefetch = 0 : i64, scratch_operands = 0 : i64, tpu.core_type = #tpu.core_type<tc>, window_params = [{transform_indices = @transform_0, window_bounds = array<i64: 8, 32>}, {pipeline_mode = #tpu.pipeline_mode<synchronous>, transform_indices = @transform_1, window_bounds = array<i64: 32, 64>}, {pipeline_mode = #tpu.pipeline_mode<synchronous>, transform_indices = @transform_2, window_bounds = array<i64: 1, 64>}, {pipeline_mode = #tpu.pipeline_mode<synchronous>, transform_indices = @transform_3, window_bounds = array<i64: 64, 128>}, {pipeline_mode = #tpu.pipeline_mode<synchronous>, transform_indices = @transform_4, window_bounds = array<i64: 1, 128>}, {transform_indices = @transform_5, window_bounds = array<i64: 8, 128>}]} {
    %c0 = arith.constant 0 : index
    %c0_0 = arith.constant 0 : index
    %0 = vector.load %arg1[%c0, %c0_0] : memref<8x32xf32, #tpu.memory_space<vmem>>, vector<8x32xf32>
    %1 = arith.truncf %0 : vector<8x32xf32> to vector<8x32xbf16>
    %c0_1 = arith.constant 0 : index
    %c0_2 = arith.constant 0 : index
    %2 = vector.load %arg2[%c0_1, %c0_2] : memref<32x64xbf16, #tpu.memory_space<vmem>>, vector<32x64xbf16>
    %cst = arith.constant dense<0.000000e+00> : vector<8x64xf32>
    %3 = tpu.matmul %1, %2, %cst {dimension_numbers = #tpu.dot_dimension_numbers<[1], [0], [0], [1], [0, 0, 1, 1], [], []>} : vector<8x32xbf16>, vector<32x64xbf16>, vector<8x64xf32> -> vector<8x64xf32>
    %c0_3 = arith.constant 0 : index
    %c0_4 = arith.constant 0 : index
    %4 = vector.load %arg3[%c0_3, %c0_4] : memref<1x64xf32, #tpu.memory_space<vmem>>, vector<1x64xf32>
    %5 = vector.broadcast %4 : vector<1x64xf32> to vector<8x64xf32>
    %6 = arith.addf %3, %5 : vector<8x64xf32>
    %cst_5 = arith.constant 0.000000e+00 : f32
    %7 = vector.broadcast %cst_5 : f32 to vector<8x64xf32>
    %8 = arith.maximumf %6, %7 : vector<8x64xf32>
    %9 = arith.truncf %8 : vector<8x64xf32> to vector<8x64xbf16>
    %c0_6 = arith.constant 0 : index
    %c0_7 = arith.constant 0 : index
    %10 = vector.load %arg4[%c0_6, %c0_7] : memref<64x128xbf16, #tpu.memory_space<vmem>>, vector<64x128xbf16>
    %cst_8 = arith.constant dense<0.000000e+00> : vector<8x128xf32>
    %11 = tpu.matmul %9, %10, %cst_8 {dimension_numbers = #tpu.dot_dimension_numbers<[1], [0], [0], [1], [0, 0, 1, 1], [], []>} : vector<8x64xbf16>, vector<64x128xbf16>, vector<8x128xf32> -> vector<8x128xf32>
    %c0_9 = arith.constant 0 : index
    %c0_10 = arith.constant 0 : index
    %12 = vector.load %arg5[%c0_9, %c0_10] : memref<1x128xf32, #tpu.memory_space<vmem>>, vector<1x128xf32>
    %13 = vector.broadcast %12 : vector<1x128xf32> to vector<8x128xf32>
    %14 = arith.addf %11, %13 : vector<8x128xf32>
    %15 = arith.truncf %14 : vector<8x128xf32> to vector<8x128xbf16>
    %c0_11 = arith.constant 0 : index
    %c0_12 = arith.constant 0 : index
    %16 = vector.load %arg6[%c0_11, %c0_12] : memref<8x128xbf16, #tpu.memory_space<vmem>>, vector<8x128xbf16>
    tpu.vector_store %arg6[%c0_11, %c0_12], %15 {strides = array<i32>} : memref<8x128xbf16, #tpu.memory_space<vmem>>, vector<8x128xbf16>,
    return
  }
  func.func @transform_0(%arg0: i32) -> (i32, i32) {
    %c0_i32 = arith.constant 0 : i32
    %c0_i32_0 = arith.constant 0 : i32
    return %arg0, %c0_i32 : i32, i32
  }
  func.func @transform_1(%arg0: i32) -> (i32, i32) {
    %c0_i32 = arith.constant 0 : i32
    %c0_i32_0 = arith.constant 0 : i32
    %c0_i32_1 = arith.constant 0 : i32
    return %c0_i32, %c0_i32_0 : i32, i32
  }
  func.func @transform_2(%arg0: i32) -> (i32, i32) {
    %c0_i32 = arith.constant 0 : i32
    %c0_i32_0 = arith.constant 0 : i32
    %c0_i32_1 = arith.constant 0 : i32
    return %c0_i32, %c0_i32_0 : i32, i32
  }
  func.func @transform_3(%arg0: i32) -> (i32, i32) {
    %c0_i32 = arith.constant 0 : i32
    %c0_i32_0 = arith.constant 0 : i32
    %c0_i32_1 = arith.constant 0 : i32
    return %c0_i32, %c0_i32_0 : i32, i32
  }
  func.func @transform_4(%arg0: i32) -> (i32, i32) {
    %c0_i32 = arith.constant 0 : i32
    %c0_i32_0 = arith.constant 0 : i32
    %c0_i32_1 = arith.constant 0 : i32
    return %c0_i32, %c0_i32_0 : i32, i32
  }
  func.func @transform_5(%arg0: i32) -> (i32, i32) {
    %c0_i32 = arith.constant 0 : i32
    %c0_i32_0 = arith.constant 0 : i32
    return %arg0, %c0_i32 : i32, i32
  }
}

</mosaic_0001>

<bundles_post_ra>
// kernel: tpu_custom_call.1
= control target key start
LH: loop header
LB: loop body
LE: loop exit
PB: predicated region body
PF: predicated region fallthrough
CT: control target
= control target key end

     0   :  { %10 = vsyncpa [#allocation3], 0  ;;  %s477_s0 = inlined_call_operand.hbm [shape: f32[8,32], index: 0, kind: input, shape index: {}]   ;;  %s478_s1 = inlined_call_operand.hbm [shape: bf16[32,64], index: 1, kind: input, shape index: {}]   ;;  %s479_s2 = inlined_call_operand.vmem [shape: f32[1,64], index: 2, kind: input, shape index: {}]   ;;  %s480_s3 = inlined_call_operand.hbm [shape: bf16[64,128], index: 3, kind: input, shape index: {}]   ;;  %s481_s4 = inlined_call_operand.vmem [shape: f32[1,128], index: 4, kind: input, shape index: {}]   ;;  %s482_s5 = inlined_call_operand.hbm [shape: bf16[8,128], index: 5, kind: output, shape index: {}]  }
   0x1   :  { %11 = vsyncpa [#allocation6], 0 }
   0x2   :  { %12 = vsyncpa [#allocation4], 0  ;;  %s379_s18 = smov [#allocation5]   ;;  %s285_s22 = scalar_lea.hbm %s478_s1, 256 }
   0x3   :  { %s28_s19 = sshll.u32 %s379_s18, 4  ;;  %p286_p0 = scmp.ne.s32.totalorder %s478_s1, %s285_s22  ;;  %s29_s19 = int_to_ptr.vmem [resolvable:$true] %s28_s19 }
   0x4   :  { %p289_p1 = scmp.lt.u32.totalorder %s285_s22, %s478_s1 }
   0x6   :  { %p291_p2 = pnand %p289_p1, %p286_p0 }
   0x8   :  { %294 = shalt.err (!%p291_p2)
}
   0x9   :  { %s295_s27 = scalar_lea.vmem %s29_s19, 256  ;;  %p300_p4 = scmp.lt.s32.totalorder %s29_s19, %s29_s19 }
   0xa   :  { %p296_p3 = scmp.ne.s32.totalorder %s29_s19, %s295_s27  ;;  %p301_p5 = scmp.lt.s32.totalorder %s295_s27, %s295_s27 }
   0xc   :  { %p302_p6 = por %p301_p5, %p300_p4 }
   0xe   :  { %p303_p7 = pnand %p302_p6, %p296_p3 }
  0x10   :  { %306 = shalt.err (!%p303_p7)
}
  0x11   :  { %s380_s28 = smov 64   ;;  %s381_s29 = smov 4  }
  0x12   :  { %34 = dma.hbm_to_vmem [thread:$0]  %s478_s1, 256, %s29_s19, [#allocation6], %s380_s28, %s380_s28, %s381_s29  }
  0x13   :  { %s382_s7 = smov [#allocation2]   ;;  %s383_s9 = smov [#allocation7]  }
  0x14   :  { %s19_s8 = sshll.u32 %s382_s7, 4  ;;  %s42_s10 = sshll.u32 %s383_s9, 4  ;;  %s20_s8 = int_to_ptr.vmem [resolvable:$true] %s19_s8  ;;  %s43_s10 = int_to_ptr.vmem [resolvable:$true] %s42_s10 }
  0x15   :  { %s307_s13 = scalar_lea.hbm %s477_s0, 128 }
  0x16   :  { %p308_p8 = scmp.ne.s32.totalorder %s477_s0, %s307_s13  ;;  %p311_p9 = scmp.lt.u32.totalorder %s307_s13, %s477_s0 }
  0x18   :  { %p313_p10 = pnand %p311_p9, %p308_p8 }
  0x1a   :  { %316 = shalt.err (!%p313_p10)
}
  0x1b   :  { %s317_s1 = scalar_lea.vmem %s20_s8, 128  ;;  %p322_p12 = scmp.lt.s32.totalorder %s20_s8, %s20_s8 }
  0x1c   :  { %p318_p11 = scmp.ne.s32.totalorder %s20_s8, %s317_s1  ;;  %p323_p13 = scmp.lt.s32.totalorder %s317_s1, %s317_s1 }
  0x1e   :  { %p324_p0 = por %p323_p13, %p322_p12 }
  0x20   :  { %p325_p1 = pnand %p324_p0, %p318_p11 }
  0x22   :  { %328 = shalt.err (!%p325_p1)
}
  0x23   :  { %22 = dma.hbm_to_vmem [thread:$0]  %s477_s0, 128, %s20_s8, [#allocation3]  }
  0x24   :  { %s329_s22 = scalar_lea.hbm %s480_s3, 512 }
  0x25   :  { %p330_p2 = scmp.ne.s32.totalorder %s480_s3, %s329_s22  ;;  %p333_p3 = scmp.lt.u32.totalorder %s329_s22, %s480_s3 }
  0x27   :  { %p335_p4 = pnand %p333_p3, %p330_p2 }
  0x29   :  { %338 = shalt.err (!%p335_p4)
}
  0x2a   :  { %s339_s27 = scalar_lea.vmem %s43_s10, 512  ;;  %p344_p6 = scmp.lt.s32.totalorder %s43_s10, %s43_s10 }
  0x2b   :  { %p340_p5 = scmp.ne.s32.totalorder %s43_s10, %s339_s27  ;;  %p345_p7 = scmp.lt.s32.totalorder %s339_s27, %s339_s27 }
  0x2d   :  { %p346_p8 = por %p345_p7, %p344_p6 }
  0x2f   :  { %p347_p9 = pnand %p346_p8, %p340_p5 }
  0x31   :  { %350 = shalt.err (!%p347_p9)
}
  0x32   :  { %48 = dma.hbm_to_vmem [thread:$0]  %s480_s3, 512, %s43_s10, [#allocation6], %s380_s28, %s380_s28, %s381_s29  }
  0x33   :  { %373 = dma.done.wait [#allocation3], 128  }
  0x34   :  { %374 = vsyncadd [#allocation3], 4294967168 }
  0x35   :  { %375 = dma.done.wait [#allocation6], 768  }
  0x36   :  { %376 = vsyncadd [#allocation6], 4294966528  ;;  %v384_v0 = vmov 0.0   ;;  %vm385_vm0 = vmmov 0   ;;  %v279_v1 = vld [vmem:[#allocation5] sm:$0xff]   ;;  %v280_v2 = vld [vmem:[#allocation5 + $0x8] sm:$0xff]  }
  0x37   :  { %251 = vmatprep.subr.bf16.mxu0 %v384_v0  ;;  %255 = vmatprep.mubr.msk.bf16.mxu0 %vm385_vm0, %v384_v0  ;;  %v61_v3 = vld [vmem:[#allocation2] sm:$0xff]  ;;  %v281_v4 = vld [vmem:[#allocation7] sm:$0xff]   ;;  %vm86_vm1 = vcmask 261120   ;;  %v283_v7 = vld [vmem:[#allocation7 + $0x10] sm:$0xff]   ;;  %vm171_vm2 = vcmask 523264   ;;  %s386_s7 = smov [#allocation8]  }
  0x38   :  { %259 = vmatprep.subr.bf16.mxu1 %v384_v0  ;;  %267 = vmatprep.mubr.msk.bf16.mxu1 %vm385_vm0, %v384_v0  ;;  %v282_v5 = vld [vmem:[#allocation7 + $0x8] sm:$0xff]   ;;  %v62_v6 = vpack.c.bf16 %v61_v3, %v61_v3  ;;  %v284_v8 = vld [vmem:[#allocation7 + $0x18] sm:$0xff]   ;;  %s223_s8 = sshll.u32 %s386_s7, 4  ;;  %s224_s8 = int_to_ptr.vmem [resolvable:$true] %s223_s8 }
  0x39   :  { %252 = vmatpush3.bf16.msra.mxu0 %v279_v1  ;;  %260 = vmatpush3.bf16.msra.mxu1 %v281_v4  ;;  %v233_v9 = vld [vmem:[%s479_s2] ss:$0 sm:$0xff]  ;;  %s351_s2 = scalar_lea.vmem %s224_s8, 64  ;;  %p356_p11 = scmp.lt.s32.totalorder %s224_s8, %s224_s8 }
  0x3a   :  { %253 = vmatprep.subr.bf16.mxu0 %v384_v0  ;;  %261 = vmatprep.subr.bf16.mxu1 %v384_v0  ;;  %v237_v17 = vld [vmem:[%s481_s4] ss:$0 sm:$0xff]  ;;  %p352_p10 = scmp.ne.s32.totalorder %s224_s8, %s351_s2  ;;  %p357_p12 = scmp.lt.s32.totalorder %s351_s2, %s351_s2 }
  0x3c   :  { %p358_p13 = por %p357_p12, %p356_p11 }
  0x3d   :  { %254 = vmatpush3.bf16.msra.mxu0 %v280_v2  ;;  %262 = vmatpush3.bf16.msra.mxu1 %v282_v5 }
  0x3e   :  { %263 = vmatprep.subr.bf16.mxu1 %v384_v0  ;;  %p359_p0 = pnand %p358_p13, %p352_p10 }
  0x40   :  { %256 = vmatmul.mubr.msk.bf16.vlgmr.msra.gmra.mrb[0].mxu0 %vm86_vm1, %v62_v6 }
  0x41   :  { %264 = vmatpush3.bf16.msra.mxu1 %v283_v7 }
  0x42   :  { %265 = vmatprep.subr.bf16.mxu1 %v384_v0 }
  0x45   :  { %266 = vmatpush3.bf16.msra.mxu1 %v284_v8 }
 0x113   :  { %v124_v10 = vpop.f32.mrb[0].mxu0 }
 0x114   :  { %v125_v11 = vadd.f32 %v233_v9, %v124_v10  ;;  %v257_v12 = vpop.f32.mrb[1].mxu0 }
 0x115   :  { %v127_v13 = vpop.f32.mrb[2].mxu0 }
 0x116   :  { %v130_v14 = vmax.f32 %v125_v11, 0.0  ;;  %v258_v15 = vpop.f32.mrb[3].mxu0 }
 0x118   :  { %v131_v16 = vpack.c.bf16 %v130_v14, %v130_v14 }
 0x11a   :  { %268 = vmatmul.mubr.msk.bf16.vlgmr.msra.gmra.mrb[0].mxu1 %vm171_vm2, %v131_v16 }
 0x1ed   :  { %v209_v18 = vpop.f32.mrb[0].mxu1 }
 0x1ee   :  { %v210_v19 = vadd.f32 %v237_v17, %v209_v18  ;;  %v269_v20 = vpop.f32.mrb[1].mxu1 }
 0x1ef   :  { %v212_v21 = vpop.f32.mrb[2].mxu1 }
 0x1f0   :  { %v215_v22 = vpack.c.bf16 %v210_v19, %v210_v19  ;;  %v270_v23 = vpop.f32.mrb[3].mxu1 }
 0x1f2   :  { %216 = vst [vmem:[#allocation8] sm:$0xf] %v215_v22 }
 0x1f3   :  { %362 = shalt.err (!%p359_p0)
}
 0x1f4   :  { %s363_s4 = scalar_lea.hbm %s482_s5, 64 }
 0x1f5   :  { %p364_p1 = scmp.ne.s32.totalorder %s482_s5, %s363_s4  ;;  %p367_p2 = scmp.lt.u32.totalorder %s363_s4, %s482_s5 }
 0x1f7   :  { %p369_p3 = pnand %p367_p2, %p364_p1 }
 0x1f9   :  { %372 = shalt.err (!%p369_p3)
}
 0x1fa   :  { %226 = dma.vmem_to_hbm [thread:$0]  %s224_s8, 64, %s482_s5, [#allocation4]  }
 0x1fb   :  { %377 = dma.done.wait [#allocation4], 64  }
 0x1fc   :  { %378 = vsyncadd [#allocation4], 4294967232 }
 0x1fd   :  { %230 = vsyncpa [#allocation3], 1 }
 0x1fe   :  { %231 = vsyncpa [#allocation6], 1 }
 0x1ff   :  { %232 = vsyncpa [#allocation4], 1 }

</bundles_post_ra>
